<compile_context>
chip_gen: v7x
topology: tpu7x:2x2x1
jax: 0.10.0
libtpu: 0.0.40
codegen_flags: <defaults>
</compile_context>

<pallas_src>
import functools
import math

import jax
import jax.numpy as jnp
from jax.experimental import pallas as pl
from jax.experimental.pallas import tpu as pltpu


def _round_up(n, m):
    return ((n + m - 1) // m) * m


def _pick_tile(n, preferred, align=8):
    """Largest multiple of `align` that divides n and is <= preferred.

    Falls back to the full extent n (always a legal block shape)."""
    if n <= preferred:
        return n
    start = preferred - (preferred % align)
    for t in range(start, 0, -align):
        if n % t == 0:
            return t
    return n


# ----------------------------------------------------------------------------
# Kernel 1: fused QKV projection.   qkv = x @ W_qkv + b_qkv
#   x_ref : (tm, D)           -- tile of the flattened (B*S, D) input
#   w_ref : (D, 3*A_pad)      -- pre-transposed, lane-padded fused weights
#   b_ref : (1, 3*A_pad)
#   o_ref : (tm, 3*A_pad)
# Weights/bias use a constant index_map -> stay resident in VMEM across steps.
# ----------------------------------------------------------------------------
def _qkv_proj_kernel(x_ref, w_ref, b_ref, o_ref):
    acc = jnp.dot(x_ref[...], w_ref[...], preferred_element_type=jnp.float32)
    o_ref[...] = (acc + b_ref[...].astype(jnp.float32)).astype(o_ref.dtype)


# ----------------------------------------------------------------------------
# Kernel 2: flash-style attention over one (query-tile, kv-tile) pair.
# Grid = (B, S//tq, S//tk);  running softmax state lives in VMEM scratch.
# ----------------------------------------------------------------------------
def _flash_attn_kernel(q_ref, k_ref, v_ref, o_ref, m_sc, l_sc, acc_sc, *, scale):
    ki = pl.program_id(2)

    @pl.when(ki == 0)
    def _init():
        m_sc[...] = jnp.full(m_sc.shape, -1e30, dtype=jnp.float32)
        l_sc[...] = jnp.zeros(l_sc.shape, dtype=jnp.float32)
        acc_sc[...] = jnp.zeros(acc_sc.shape, dtype=jnp.float32)

    q = q_ref[...]                                   # (tq, A_pad)
    k = k_ref[...]                                   # (tk, A_pad)
    v = v_ref[...]                                   # (tk, A_pad)

    # scores = (Q @ K^T) * scale; contract the attention axis of both operands
    # directly (no explicit transpose -> no XLU re-layout before the MXU push).
    s = jax.lax.dot_general(
        q, k, (((1,), (1,)), ((), ())),
        preferred_element_type=jnp.float32) * scale  # (tq, tk) f32

    m_prev = m_sc[...]
    m_new = jnp.maximum(m_prev, jnp.max(s, axis=-1, keepdims=True))
    alpha = jnp.exp(m_prev - m_new)                  # rescale of old state
    p = jnp.exp(s - m_new)                           # (tq, tk) f32

    l_sc[...] = alpha * l_sc[...] + jnp.sum(p, axis=-1, keepdims=True)
    acc_sc[...] = alpha * acc_sc[...] + jnp.dot(
        p.astype(v.dtype), v, preferred_element_type=jnp.float32)
    m_sc[...] = m_new

    @pl.when(ki == pl.num_programs(2) - 1)
    def _finalize():
        denom = l_sc[...]
        inv = pl.reciprocal(denom, approx=True)      # EUP vrcp (free slot)
        inv = inv * (2.0 - denom * inv)              # one Newton step
        o_ref[...] = (acc_sc[...] * inv).astype(o_ref.dtype)


# ----------------------------------------------------------------------------
# Wrapper
# ----------------------------------------------------------------------------
def attention_forward(x, wq, bq, wk, bk, wv, bv, *, mxu_dtype=None,
                      q_tile=256, kv_tile=256, m_tile=512):
    """x: (B, S, D_in); weights (A, D_in) PyTorch-style; biases (A,).

    Returns (B, S, A) -- same semantics as the PyTorch Attention module.
    `mxu_dtype=jnp.bfloat16` casts the matmul operands only (f32 accumulation
    and f32 softmax are kept), recommended on v6e/v7x.
    """
    B, S, D = x.shape
    A = wq.shape[0]
    out_dtype = x.dtype

    # Lane-dense attention dim: pad to a multiple of 128 with zero weight
    # columns / zero bias entries (padded q/k/v columns are exactly zero, so
    # scores and outputs are unchanged; padding is sliced off at the end).
    A_pad = _round_up(A, 128)
    pad_a = A_pad - A

    def prep_w(w):                       # (A, D) -> (D, A_pad), pre-transposed
        wt = jnp.transpose(w)
        if pad_a:
            wt = jnp.pad(wt, ((0, 0), (0, pad_a)))
        return wt

    def prep_b(b):                       # (A,) -> (A_pad,)
        return jnp.pad(b, ((0, pad_a),)) if pad_a else b

    w_qkv = jnp.concatenate([prep_w(wq), prep_w(wk), prep_w(wv)], axis=1)
    b_qkv = jnp.concatenate([prep_b(bq), prep_b(bk), prep_b(bv)]).reshape(
        1, 3 * A_pad)

    if mxu_dtype is not None:
        x_in = x.astype(mxu_dtype)
        w_qkv = w_qkv.astype(mxu_dtype)
        qkv_dtype = mxu_dtype
    else:
        x_in = x
        qkv_dtype = x.dtype

    # ---- kernel 1: fused QKV projection on the flattened (B*S, D) input ----
    M = B * S
    x_flat = x_in.reshape(M, D)
    tm = _pick_tile(M, m_tile, 8)

    qkv = pl.pallas_call(
        _qkv_proj_kernel,
        out_shape=jax.ShapeDtypeStruct((M, 3 * A_pad), qkv_dtype),
        grid_spec=pltpu.PrefetchScalarGridSpec(
            num_scalar_prefetch=0,
            grid=(M // tm,),
            in_specs=[
                pl.BlockSpec((tm, D), lambda i: (i, 0)),           # x tile
                pl.BlockSpec((D, 3 * A_pad), lambda i: (0, 0)),    # W (resident)
                pl.BlockSpec((1, 3 * A_pad), lambda i: (0, 0)),    # b (resident)
            ],
            out_specs=pl.BlockSpec((tm, 3 * A_pad), lambda i: (i, 0)),
        ),
        compiler_params=pltpu.CompilerParams(
            dimension_semantics=("parallel",)),
    )(x_flat, w_qkv, b_qkv)

    qkv = qkv.reshape(B, S, 3 * A_pad)

    # ---- kernel 2: flash-style attention, tiled over (B, q-tile, kv-tile) ---
    tq = _pick_tile(S, q_tile, 8)
    tk = _pick_tile(S, kv_tile, 8)
    nq = S // tq
    nk = S // tk
    scale = 1.0 / math.sqrt(A)          # true attention_dim, not the padded one

    kernel = functools.partial(_flash_attn_kernel, scale=scale)

    out = pl.pallas_call(
        kernel,
        out_shape=jax.ShapeDtypeStruct((B, S, A_pad), out_dtype),
        grid_spec=pltpu.PrefetchScalarGridSpec(
            num_scalar_prefetch=0,
            grid=(B, nq, nk),
            in_specs=[
                # Q / K / V are column blocks 0 / 1 / 2 of the fused qkv array.
                pl.BlockSpec((None, tq, A_pad), lambda b, qi, ki: (b, qi, 0)),
                pl.BlockSpec((None, tk, A_pad), lambda b, qi, ki: (b, ki, 1)),
                pl.BlockSpec((None, tk, A_pad), lambda b, qi, ki: (b, ki, 2)),
            ],
            out_specs=pl.BlockSpec((None, tq, A_pad),
                                   lambda b, qi, ki: (b, qi, 0)),
            scratch_shapes=[
                pltpu.VMEM((tq, 1), jnp.float32),       # running max
                pltpu.VMEM((tq, 1), jnp.float32),       # running sum
                pltpu.VMEM((tq, A_pad), jnp.float32),   # accumulator
            ],
        ),
        compiler_params=pltpu.CompilerParams(
            dimension_semantics=("parallel", "parallel", "arbitrary")),
    )(qkv, qkv, qkv)

    if pad_a:
        out = out[..., :A]
    return out


# ----------------------------------------------------------------------------
# Pure-JAX reference (matches the PyTorch module)
# ----------------------------------------------------------------------------
def _reference(x, wq, bq, wk, bk, wv, bv):
    q = x @ wq.T + bq
    k = x @ wk.T + bk
    v = x @ wv.T + bv
    scores = jnp.einsum("bsa,bta->bst", q, k) / jnp.sqrt(
        jnp.float32(k.shape[-1]))
    w = jax.nn.softmax(scores, axis=-1)
    return jnp.einsum("bst,bta->bsa", w, v)


if __name__ == "__main__":
    B, S, D_in, A = 2, 8, 32, 32

    key = jax.random.PRNGKey(0)
    kx, kq, kbq, kk, kbk, kv, kbv = jax.random.split(key, 7)

    x = jax.random.normal(kx, (B, S, D_in), dtype=jnp.float32)

    # deterministic, nn.Linear-like init: U(-1/sqrt(fan_in), 1/sqrt(fan_in))
    bound = 1.0 / jnp.sqrt(jnp.float32(D_in))
    wq = jax.random.uniform(kq, (A, D_in), jnp.float32, -bound, bound)
    bq = jax.random.uniform(kbq, (A,), jnp.float32, -bound, bound)
    wk = jax.random.uniform(kk, (A, D_in), jnp.float32, -bound, bound)
    bk = jax.random.uniform(kbk, (A,), jnp.float32, -bound, bound)
    wv = jax.random.uniform(kv, (A, D_in), jnp.float32, -bound, bound)
    bv = jax.random.uniform(kbv, (A,), jnp.float32, -bound, bound)

    ref = _reference(x, wq, bq, wk, bk, wv, bv)

    # f32 path: tight check against the reference.
    out = attention_forward(x, wq, bq, wk, bk, wv, bv)
    out = jax.block_until_ready(out)
    assert out.shape == (B, S, A)
    assert jnp.allclose(out, ref, atol=1e-5, rtol=1e-5), "f32 mismatch vs ref"

    # bf16 MXU-operand path (f32 accumulation + f32 softmax): loose check.
    out_bf16 = attention_forward(x, wq, bq, wk, bk, wv, bv,
                                 mxu_dtype=jnp.bfloat16)
    out_bf16 = jax.block_until_ready(out_bf16)
    assert out_bf16.shape == (B, S, A)
    assert jnp.allclose(out_bf16, ref, atol=2e-2, rtol=2e-2), \
        "bf16 mismatch vs ref"

    print("KERNEL_OK")
</pallas_src>

<mosaic_0001>
module attributes {stable_mosaic.version = 11 : i64} {
  func.func @_qkv_proj_kernel(%arg0: i32, %arg1: memref<16x32xf32, #tpu.memory_space<vmem>>, %arg2: memref<32x384xf32, #tpu.memory_space<vmem>>, %arg3: memref<1x384xf32, #tpu.memory_space<vmem>>, %arg4: memref<16x384xf32, #tpu.memory_space<vmem>>) attributes {dimension_semantics = [#tpu.dimension_semantics<parallel>], iteration_bounds = array<i64: 1>, scalar_prefetch = 0 : i64, scratch_operands = 0 : i64, tpu.core_type = #tpu.core_type<tc>, window_params = [{transform_indices = @transform_0, window_bounds = array<i64: 16, 32>}, {pipeline_mode = #tpu.pipeline_mode<synchronous>, transform_indices = @transform_1, window_bounds = array<i64: 32, 384>}, {pipeline_mode = #tpu.pipeline_mode<synchronous>, transform_indices = @transform_2, window_bounds = array<i64: 1, 384>}, {transform_indices = @transform_3, window_bounds = array<i64: 16, 384>}]} {
    %c0 = arith.constant 0 : index
    %c0_0 = arith.constant 0 : index
    %0 = vector.load %arg1[%c0, %c0_0] : memref<16x32xf32, #tpu.memory_space<vmem>>, vector<16x32xf32>
    %c0_1 = arith.constant 0 : index
    %c0_2 = arith.constant 0 : index
    %1 = vector.load %arg2[%c0_1, %c0_2] : memref<32x384xf32, #tpu.memory_space<vmem>>, vector<32x384xf32>
    %cst = arith.constant dense<0.000000e+00> : vector<16x384xf32>
    %2 = tpu.matmul %0, %1, %cst {dimension_numbers = #tpu.dot_dimension_numbers<[1], [0], [0], [1], [0, 0, 1, 1], [], []>} : vector<16x32xf32>, vector<32x384xf32>, vector<16x384xf32> -> vector<16x384xf32>
    %c0_3 = arith.constant 0 : index
    %c0_4 = arith.constant 0 : index
    %3 = vector.load %arg3[%c0_3, %c0_4] : memref<1x384xf32, #tpu.memory_space<vmem>>, vector<1x384xf32>
    %4 = vector.broadcast %3 : vector<1x384xf32> to vector<16x384xf32>
    %5 = arith.addf %2, %4 : vector<16x384xf32>
    %c0_5 = arith.constant 0 : index
    %c0_6 = arith.constant 0 : index
    %6 = vector.load %arg4[%c0_5, %c0_6] : memref<16x384xf32, #tpu.memory_space<vmem>>, vector<16x384xf32>
    tpu.vector_store %arg4[%c0_5, %c0_6], %5 {strides = array<i32>} : memref<16x384xf32, #tpu.memory_space<vmem>>, vector<16x384xf32>,
    return
  }
  func.func @transform_0(%arg0: i32) -> (i32, i32) {
    %c0_i32 = arith.constant 0 : i32
    %c0_i32_0 = arith.constant 0 : i32
    return %arg0, %c0_i32 : i32, i32
  }
  func.func @transform_1(%arg0: i32) -> (i32, i32) {
    %c0_i32 = arith.constant 0 : i32
    %c0_i32_0 = arith.constant 0 : i32
    %c0_i32_1 = arith.constant 0 : i32
    return %c0_i32, %c0_i32_0 : i32, i32
  }
  func.func @transform_2(%arg0: i32) -> (i32, i32) {
    %c0_i32 = arith.constant 0 : i32
    %c0_i32_0 = arith.constant 0 : i32
    %c0_i32_1 = arith.constant 0 : i32
    return %c0_i32, %c0_i32_0 : i32, i32
  }
  func.func @transform_3(%arg0: i32) -> (i32, i32) {
    %c0_i32 = arith.constant 0 : i32
    %c0_i32_0 = arith.constant 0 : i32
    return %arg0, %c0_i32 : i32, i32
  }
}

</mosaic_0001>

<bundles_post_ra>
// kernel: tpu_custom_call.1
= control target key start
LH: loop header
LB: loop body
LE: loop exit
PB: predicated region body
PF: predicated region fallthrough
CT: control target
= control target key end

     0   :  { %8 = vsyncpa [#allocation3], 0  ;;  %s447_s0 = inlined_call_operand.hbm [shape: f32[16,32], index: 0, kind: input, shape index: {}]   ;;  %s448_s1 = inlined_call_operand.hbm [shape: f32[32,384], index: 1, kind: input, shape index: {}]   ;;  %s449_s2 = inlined_call_operand.vmem [shape: f32[1,384], index: 2, kind: input, shape index: {}]   ;;  %s450_s3 = inlined_call_operand.hbm [shape: f32[16,384], index: 3, kind: output, shape index: {}]  }
   0x1   :  { %9 = vsyncpa [#allocation6], 0 }
   0x2   :  { %10 = vsyncpa [#allocation4], 0  ;;  %s374_s12 = smov [#allocation2]   ;;  %s302_s16 = scalar_lea.hbm %s447_s0, 256 }
   0x3   :  { %s16_s13 = sshll.u32 %s374_s12, 4  ;;  %p303_p0 = scmp.ne.s32.totalorder %s447_s0, %s302_s16  ;;  %s17_s13 = int_to_ptr.vmem [resolvable:$true] %s16_s13 }
   0x4   :  { %p306_p1 = scmp.lt.u32.totalorder %s302_s16, %s447_s0 }
   0x6   :  { %p308_p2 = pnand %p306_p1, %p303_p0 }
   0x8   :  { %311 = shalt.err (!%p308_p2)
}
   0x9   :  { %s312_s21 = scalar_lea.vmem %s17_s13, 256  ;;  %p317_p4 = scmp.lt.s32.totalorder %s17_s13, %s17_s13 }
   0xa   :  { %p313_p3 = scmp.ne.s32.totalorder %s17_s13, %s312_s21  ;;  %p318_p5 = scmp.lt.s32.totalorder %s312_s21, %s312_s21 }
   0xc   :  { %p319_p6 = por %p318_p5, %p317_p4 }
   0xe   :  { %p320_p7 = pnand %p319_p6, %p313_p3 }
  0x10   :  { %323 = shalt.err (!%p320_p7)
}
  0x11   :  { %s375_s22 = smov 128   ;;  %s376_s23 = smov 8  }
  0x12   :  { %22 = dma.hbm_to_vmem [thread:$0]  %s447_s0, 256, %s17_s13, [#allocation3], %s375_s22, %s375_s22, %s376_s23  }
  0x13   :  { %s377_s26 = smov [#allocation5]   ;;  %s324_s30 = scalar_lea.hbm %s448_s1, 1536 }
  0x14   :  { %s28_s27 = sshll.u32 %s377_s26, 4  ;;  %p325_p8 = scmp.ne.s32.totalorder %s448_s1, %s324_s30  ;;  %s29_s27 = int_to_ptr.vmem [resolvable:$true] %s28_s27 }
  0x15   :  { %p328_p9 = scmp.lt.u32.totalorder %s324_s30, %s448_s1 }
  0x17   :  { %p330_p10 = pnand %p328_p9, %p325_p8 }
  0x19   :  { %333 = shalt.err (!%p330_p10)
}
  0x1a   :  { %s334_s8 = scalar_lea.vmem %s29_s27, 1536  ;;  %p339_p12 = scmp.lt.s32.totalorder %s29_s27, %s29_s27 }
  0x1b   :  { %p335_p11 = scmp.ne.s32.totalorder %s29_s27, %s334_s8  ;;  %p340_p13 = scmp.lt.s32.totalorder %s334_s8, %s334_s8 }
  0x1d   :  { %p341_p0 = por %p340_p13, %p339_p12 }
  0x1f   :  { %p342_p1 = pnand %p341_p0, %p335_p11 }
  0x21   :  { %345 = shalt.err (!%p342_p1)
}
  0x22   :  { %s378_s0 = smov 384   ;;  %s379_s9 = smov 24  }
  0x23   :  { %34 = dma.hbm_to_vmem [thread:$0]  %s448_s1, 1536, %s29_s27, [#allocation6], %s378_s0, %s378_s0, %s379_s9  }
  0x24   :  { %368 = dma.done.wait [#allocation3], 256  }
  0x25   :  { %369 = vsyncadd [#allocation3], 4294967040 }
  0x26   :  { %370 = dma.done.wait [#allocation6], 1536  }
  0x27   :  { %371 = vsyncadd [#allocation6], 4294965760  ;;  %v380_v0 = vmov 0.0   ;;  %v46_v1 = vld [vmem:[#allocation5 + $0x8] sm:$0xff]  ;;  %v49_v2 = vld [vmem:[#allocation5 + $0x20] sm:$0xff]  ;;  %vm74_vm0 = vcmask 261120   ;;  %v59_v21 = vlaneseq }
  0x28   :  { %145 = vmatprep.mubr.f32.mxu0 %v380_v0  ;;  %v45_v3 = vld [vmem:[#allocation5] sm:$0xff]  ;;  %v278_v4 = vpack.c.bf16 %v49_v2, %v46_v1  ;;  %v48_v5 = vld [vmem:[#allocation5 + $0x18] sm:$0xff]  ;;  %v47_v6 = vld [vmem:[#allocation5 + $0x10] sm:$0xff]  ;;  %s381_s13 = smov [#allocation7]  }
  0x29   :  { %v50_v7 = vld [vmem:[#allocation5 + $0x28] sm:$0xff]  ;;  %v280_v8 = vpack.c.bf16 %v48_v5, %v45_v3  ;;  %v52_v10 = vld [vmem:[#allocation5 + $0x38] sm:$0xff]  ;;  %v55_v11 = vld [vmem:[#allocation5 + $0x50] sm:$0xff]  ;;  %v60_v22 = vshrl.u32 %v59_v21, 7  ;;  %s244_s14 = sshll.u32 %s381_s13, 4  ;;  %s245_s14 = int_to_ptr.vmem [resolvable:$true] %s244_s14 }
  0x2a   :  { %v286_v9 = vpack.c.bf16 %v50_v7, %v47_v6  ;;  %v51_v12 = vld [vmem:[#allocation5 + $0x30] sm:$0xff]  ;;  %279 = vmatprep.subr.bf16.mxu0 %v278_v4  ;;  %v282_v13 = vpack.c.bf16 %v55_v11, %v52_v10  ;;  %v54_v14 = vld [vmem:[#allocation5 + $0x48] sm:$0xff]  ;;  %v53_v15 = vld [vmem:[#allocation5 + $0x40] sm:$0xff]  ;;  %p351_p3 = scmp.lt.s32.totalorder %s245_s14, %s245_s14 }
  0x2b   :  { %v56_v16 = vld [vmem:[#allocation5 + $0x58] sm:$0xff]  ;;  %281 = vmatpush1.bf16.msra.mxu0 %v280_v8  ;;  %v284_v17 = vpack.c.bf16 %v54_v14, %v51_v12  ;;  %v43_v19 = vld [vmem:[#allocation2] sm:$0xff]  ;;  %v61_v23 = vsub.s32 0, %v60_v22  ;;  %v65_v25 = vsub.s32 1, %v60_v22  ;;  %v69_v26 = vsub.s32 2, %v60_v22 }
  0x2c   :  { %287 = vmatprep.subr.bf16.mxu1 %v286_v9  ;;  %v290_v18 = vpack.c.bf16 %v56_v16, %v53_v15  ;;  %283 = vmatprep.subr.bf16.mxu0 %v282_v13  ;;  %v44_v20 = vld [vmem:[#allocation2 + $0x8] sm:$0xff]  ;;  %v57_v24 = vld [vmem:[%s449_s2] sm:$0x7]  ;;  %s346_s2 = scalar_lea.vmem %s245_s14, 768 }
  0x2d   :  { %289 = vmatpush3.bf16.msra.mxu1 %v286_v9  ;;  %275 = vmatprep.mubr.msk.f32.mxu1 %vm74_vm0, %v43_v19  ;;  %v62_v27 = vrot.slane %v57_v24, %v61_v23  ;;  %v66_v28 = vrot.slane %v57_v24, %v65_v25  ;;  %v70_v29 = vrot.slane %v57_v24, %v69_v26  ;;  %p347_p2 = scmp.ne.s32.totalorder %s245_s14, %s346_s2  ;;  %p352_p4 = scmp.lt.s32.totalorder %s346_s2, %s346_s2 }
  0x2e   :  { %291 = vmatprep.subr.bf16.mxu1 %v290_v18 }
  0x2f   :  { %285 = vmatpush1.bf16.msra.mxu0 %v284_v17  ;;  %p353_p5 = por %p352_p4, %p351_p3 }
  0x31   :  { %293 = vmatpush3.bf16.msra.mxu1 %v290_v18  ;;  %p354_p6 = pnand %p353_p5, %p347_p2 }
  0x32   :  { %257 = vmatmul.mubr.msk.f32.vlgmr.msra.gmra.mrb[0].mxu0 %vm74_vm0, %v43_v19 }
  0x33   :  { %151 = vmatprep.mubr.f32.mxu0 %v380_v0 }
  0x34   :  { %276 = vmatmul.mubr.msk.f32.vlgmr.msra.gmra.mrb[0].mxu1 %vm74_vm0, %v44_v20 }
  0x36   :  { %258 = vmatmul.mubr.msk.f32.gmra.mrb[2].mxu0 %vm74_vm0, %v44_v20 }
 0x105   :  { %v147_v30 = vpop.f32.mrb[0].mxu0 }
 0x106   :  { %v148_v31 = vadd.f32 %v147_v30, %v62_v27  ;;  %v149_v32 = vpop.f32.mrb[1].mxu0 }
 0x107   :  { %v277_v33 = vpop.f32.mrb[0].mxu1  ;;  %v150_v34 = vadd.f32 %v149_v32, %v66_v28 }
 0x108   :  { %v230_v35 = vadd.f32 %v277_v33, %v70_v29  ;;  %v224_v36 = vpop.f32.mrb[1].mxu1  ;;  %233 = vst [vmem:[#allocation7] sm:$0xff] %v148_v31 }
 0x109   :  { %v225_v37 = vadd.f32 %v224_v36, %v70_v29  ;;  %234 = vst [vmem:[#allocation7 + $0x8] sm:$0xff] %v150_v34  ;;  %v153_v38 = vpop.f32.mrb[2].mxu0 }
 0x10a   :  { %238 = vst [vmem:[#allocation7 + $0x28] sm:$0xff] %v230_v35  ;;  %v154_v39 = vadd.f32 %v153_v38, %v62_v27  ;;  %v155_v40 = vpop.f32.mrb[3].mxu0 }
 0x10b   :  { %235 = vst [vmem:[#allocation7 + $0x10] sm:$0xff] %v225_v37  ;;  %v156_v41 = vadd.f32 %v155_v40, %v66_v28 }
 0x10c   :  { %236 = vst [vmem:[#allocation7 + $0x18] sm:$0xff] %v154_v39 }
 0x10d   :  { %237 = vst [vmem:[#allocation7 + $0x20] sm:$0xff] %v156_v41 }
 0x10e   :  { %357 = shalt.err (!%p354_p6)
}
 0x10f   :  { %s358_s17 = scalar_lea.hbm %s450_s3, 768 }
 0x110   :  { %p359_p7 = scmp.ne.s32.totalorder %s450_s3, %s358_s17  ;;  %p362_p8 = scmp.lt.u32.totalorder %s358_s17, %s450_s3 }
 0x112   :  { %p364_p9 = pnand %p362_p8, %p359_p7 }
 0x114   :  { %367 = shalt.err (!%p364_p9)
}
 0x115   :  { %250 = dma.vmem_to_hbm [thread:$0]  %s245_s14, 768, %s450_s3, [#allocation4], %s378_s0, %s378_s0, %s379_s9  }
 0x116   :  { %372 = dma.done.wait [#allocation4], 768  }
 0x117   :  { %373 = vsyncadd [#allocation4], 4294966528 }
 0x118   :  { %254 = vsyncpa [#allocation3], 1 }
 0x119   :  { %255 = vsyncpa [#allocation6], 1 }
 0x11a   :  { %256 = vsyncpa [#allocation4], 1 }

</bundles_post_ra>
